<compile_context>
chip_gen: v7x
topology: tpu7x:2x2x1
jax: 0.10.0
libtpu: 0.0.40
codegen_flags: <defaults>
</compile_context>

<pallas_src>
import jax
import jax.numpy as jnp
from jax.experimental import pallas as pl
from jax.experimental.pallas import tpu as pltpu

_TARGET_STEP_BYTES = 4 * 1024 * 1024   # in+out HBM traffic per grid step
_VMEM_TILE_BUDGET = 24 * 1024 * 1024   # double-buffered in+out tiles (v7x-safe)


def _round_up(x, m):
    return ((x + m - 1) // m) * m


def _round_down(x, m):
    return (x // m) * m


def _choose_spatial_tile(hw, c_in, c_out, n, itemsize):
    """Lane-dense spatial tile (multiple of 128) sized from a byte budget."""
    bytes_per_col = (c_in + c_out) * itemsize            # one read + one write per column
    t = max(128, _round_down(_TARGET_STEP_BYTES // bytes_per_col, 128))
    t_vmem = max(128, _round_down(_VMEM_TILE_BUDGET // (bytes_per_col * 2), 128))
    t = min(t, t_vmem)
    if hw <= 128:
        return hw                        # full extent: always a legal block dim
    t = min(t, _round_up(hw, 128))
    if n == 1:
        # Keep >=2 spatial tiles so v7x's two TensorCores both get work.
        t = min(t, max(128, _round_up(-(-hw // 2), 128)))
    # Prefer a tile that divides hw exactly (no partial boundary block at all).
    if hw % 128 == 0:
        for cand in range(t, 127, -128):
            if hw % cand == 0:
                return cand
    return t                             # partial last block; Pallas masks its stores


def _ae_fused_kernel(x_ref, w_ref, b_ref, out_ref):
    # x_ref  : (1, C_in,  T)  input tile, lanes = spatial (dense)
    # w_ref  : (C_out, C_in)  folded (decoder . encoder) weight, VMEM-resident
    # b_ref  : (C_out, 1)     folded bias, VMEM-resident
    # out_ref: (1, C_out, T)  lane-dense output tile
    x = x_ref[0].astype(jnp.float32)                                   # (C_in, T)
    y = jnp.dot(w_ref[...], x, preferred_element_type=jnp.float32)     # (C_out, T)
    out_ref[0] = (y + b_ref[...]).astype(out_ref.dtype)


@jax.jit
def ae_ganbase_forward(x_nchw, w_enc, b_enc, w_dec, b_dec):
    """AE_GanBase.forward: dec = decode(encode(x)).

    x_nchw : (N, C_in, H, W)  (PyTorch NCHW convention; f32 or bf16 storage)
    w_enc  : (C_in, C_lat)    1x1-conv encoder weight (transposed, squeezed)
    b_enc  : (C_lat,)
    w_dec  : (C_lat, C_out)   1x1-conv decoder weight
    b_dec  : (C_out,)
    returns: (N, C_out, H, W) in x's dtype
    """
    n, c_in, h, w = x_nchw.shape
    c_out = w_dec.shape[1]
    hw = h * w

    # Fold encode->decode (both linear) once, at highest precision so the only
    # deviation from the unfused reference is reassociation.
    hi = jax.lax.Precision.HIGHEST
    w_fold_t = jnp.dot(w_enc, w_dec, precision=hi).T.astype(jnp.float32)       # (C_out, C_in)
    b_fold = (jnp.dot(b_enc, w_dec, precision=hi) + b_dec).astype(jnp.float32)
    b_fold = b_fold.reshape(c_out, 1)

    itemsize = jnp.dtype(x_nchw.dtype).itemsize
    t = _choose_spatial_tile(hw, c_in, c_out, n, itemsize)

    # NCHW kept: (N, C_in, H*W) view is a free reshape (no transpose, no pad).
    x3 = x_nchw.reshape(n, c_in, hw)
    grid = (n, pl.cdiv(hw, t))

    cost = pl.CostEstimate(
        flops=2 * n * hw * c_in * c_out,
        transcendentals=0,
        bytes_accessed=itemsize * n * hw * (c_in + c_out) + 4 * (c_out * c_in + c_out),
    )

    out3 = pl.pallas_call(
        _ae_fused_kernel,
        out_shape=jax.ShapeDtypeStruct((n, c_out, hw), x_nchw.dtype),
        grid_spec=pltpu.PrefetchScalarGridSpec(
            num_scalar_prefetch=0,
            grid=grid,
            in_specs=[
                pl.BlockSpec((1, c_in, t), lambda b, j: (b, 0, j)),   # x tile
                pl.BlockSpec((c_out, c_in), lambda b, j: (0, 0)),     # W (resident)
                pl.BlockSpec((c_out, 1), lambda b, j: (0, 0)),        # bias (resident)
            ],
            out_specs=pl.BlockSpec((1, c_out, t), lambda b, j: (b, 0, j)),
        ),
        compiler_params=pltpu.CompilerParams(
            dimension_semantics=("parallel", "parallel"),
            vmem_limit_bytes=32 * 1024 * 1024,
        ),
        cost_estimate=cost,
    )(x3, w_fold_t, b_fold)

    return out3.reshape(n, c_out, h, w)


def _reference(x_nchw, w_enc, b_enc, w_dec, b_dec):
    # Unfused reference: encode then decode (matches PyTorch semantics).
    hi = jax.lax.Precision.HIGHEST
    x = jnp.transpose(x_nchw, (0, 2, 3, 1))
    lat = jnp.einsum("nhwc,cl->nhwl", x, w_enc, precision=hi) + b_enc
    dec = jnp.einsum("nhwl,lo->nhwo", lat, w_dec, precision=hi) + b_dec
    return jnp.transpose(dec, (0, 3, 1, 2))


if __name__ == "__main__":
    key = jax.random.PRNGKey(0)
    k_x, k_we, k_be, k_wd, k_bd = jax.random.split(key, 5)

    N, C_IN, H, W = 2, 4, 16, 16
    C_LAT = 32
    C_OUT = C_IN

    x = jax.random.normal(k_x, (N, C_IN, H, W), dtype=jnp.float32)
    w_enc = jax.random.normal(k_we, (C_IN, C_LAT), dtype=jnp.float32) * 0.1
    b_enc = jax.random.normal(k_be, (C_LAT,), dtype=jnp.float32) * 0.1
    w_dec = jax.random.normal(k_wd, (C_LAT, C_OUT), dtype=jnp.float32) * 0.1
    b_dec = jax.random.normal(k_bd, (C_OUT,), dtype=jnp.float32) * 0.1

    out = ae_ganbase_forward(x, w_enc, b_enc, w_dec, b_dec)
    out = jax.block_until_ready(out)

    ref = _reference(x, w_enc, b_enc, w_dec, b_dec)
    assert out.shape == (N, C_OUT, H, W)
    err = float(jnp.max(jnp.abs(out - ref)))
    assert jnp.allclose(out, ref, atol=2e-3, rtol=1e-3), err

    print("KERNEL_OK")
</pallas_src>

<mosaic_0001>
module attributes {stable_mosaic.version = 11 : i64} {
  func.func @_ae_fused_kernel(%arg0: i32, %arg1: i32, %arg2: memref<1x4x256xf32, #tpu.memory_space<vmem>>, %arg3: memref<4x4xf32, #tpu.memory_space<vmem>>, %arg4: memref<4x1xf32, #tpu.memory_space<vmem>>, %arg5: memref<1x4x256xf32, #tpu.memory_space<vmem>>) attributes {dimension_semantics = [#tpu.dimension_semantics<parallel>, #tpu.dimension_semantics<parallel>], iteration_bounds = array<i64: 2, 1>, scalar_prefetch = 0 : i64, scratch_operands = 0 : i64, tpu.core_type = #tpu.core_type<tc>, window_params = [{transform_indices = @transform_0, window_bounds = array<i64: 1, 4, 256>}, {pipeline_mode = #tpu.pipeline_mode<synchronous>, transform_indices = @transform_1, window_bounds = array<i64: 4, 4>}, {pipeline_mode = #tpu.pipeline_mode<synchronous>, transform_indices = @transform_2, window_bounds = array<i64: 4, 1>}, {transform_indices = @transform_3, window_bounds = array<i64: 1, 4, 256>}]} {
    %c0 = arith.constant 0 : index
    %c0_0 = arith.constant 0 : index
    %c0_1 = arith.constant 0 : index
    %0 = vector.load %arg2[%c0, %c0_0, %c0_1] : memref<1x4x256xf32, #tpu.memory_space<vmem>>, vector<1x4x256xf32>
    %1 = vector.shape_cast %0 : vector<1x4x256xf32> to vector<4x256xf32>
    %c0_2 = arith.constant 0 : index
    %c0_3 = arith.constant 0 : index
    %2 = vector.load %arg3[%c0_2, %c0_3] : memref<4x4xf32, #tpu.memory_space<vmem>>, vector<4x4xf32>
    %cst = arith.constant dense<0.000000e+00> : vector<4x256xf32>
    %3 = tpu.matmul %2, %1, %cst {dimension_numbers = #tpu.dot_dimension_numbers<[1], [0], [0], [1], [0, 0, 1, 1], [], []>} : vector<4x4xf32>, vector<4x256xf32>, vector<4x256xf32> -> vector<4x256xf32>
    %c0_4 = arith.constant 0 : index
    %c0_5 = arith.constant 0 : index
    %4 = vector.load %arg4[%c0_4, %c0_5] : memref<4x1xf32, #tpu.memory_space<vmem>>, vector<4x1xf32>
    %5 = vector.broadcast %4 : vector<4x1xf32> to vector<4x256xf32>
    %6 = arith.addf %3, %5 : vector<4x256xf32>
    %c0_6 = arith.constant 0 : index
    %c0_7 = arith.constant 0 : index
    %c0_8 = arith.constant 0 : index
    %7 = vector.load %arg5[%c0_6, %c0_7, %c0_8] : memref<1x4x256xf32, #tpu.memory_space<vmem>>, vector<1x4x256xf32>
    %8 = vector.shape_cast %7 : vector<1x4x256xf32> to vector<4x256xf32>
    %9 = vector.shape_cast %6 : vector<4x256xf32> to vector<1x4x256xf32>
    tpu.vector_store %arg5[%c0_6, %c0_7, %c0_8], %9 {strides = array<i32>} : memref<1x4x256xf32, #tpu.memory_space<vmem>>, vector<1x4x256xf32>,
    return
  }
  func.func @transform_0(%arg0: i32, %arg1: i32) -> (i32, i32, i32) {
    %c0_i32 = arith.constant 0 : i32
    %c0_i32_0 = arith.constant 0 : i32
    return %arg0, %c0_i32, %arg1 : i32, i32, i32
  }
  func.func @transform_1(%arg0: i32, %arg1: i32) -> (i32, i32) {
    %c0_i32 = arith.constant 0 : i32
    %c0_i32_0 = arith.constant 0 : i32
    %c0_i32_1 = arith.constant 0 : i32
    return %c0_i32, %c0_i32_0 : i32, i32
  }
  func.func @transform_2(%arg0: i32, %arg1: i32) -> (i32, i32) {
    %c0_i32 = arith.constant 0 : i32
    %c0_i32_0 = arith.constant 0 : i32
    %c0_i32_1 = arith.constant 0 : i32
    return %c0_i32, %c0_i32_0 : i32, i32
  }
  func.func @transform_3(%arg0: i32, %arg1: i32) -> (i32, i32, i32) {
    %c0_i32 = arith.constant 0 : i32
    %c0_i32_0 = arith.constant 0 : i32
    return %arg0, %c0_i32, %arg1 : i32, i32, i32
  }
}

</mosaic_0001>

<bundles_post_ra>
// kernel: ae_ganbase_forward.1
= control target key start
LH: loop header
LB: loop body
LE: loop exit
PB: predicated region body
PF: predicated region fallthrough
CT: control target
= control target key end

     0   :  { %s482_s12 = smov 0   ;;  %s484_s13 = smov 0   ;;  %s521_s0 = inlined_call_operand.vmem [shape: f32[2,4,256], index: 0, kind: input, shape index: {}]   ;;  %s522_s1 = inlined_call_operand.vmem [shape: f32[4,4], index: 1, kind: input, shape index: {}]   ;;  %s523_s2 = inlined_call_operand.vmem [shape: f32[4,1], index: 2, kind: input, shape index: {}]   ;;  %s524_s3 = inlined_call_operand.vmem [shape: f32[2,4,256], index: 3, kind: output, shape index: {}]  }
   0x1   :  { %s486_s14 = smov 0  }
   0x2 LB: > { %s25_s15 = sadd.s32 1, %s454_s13  ;;  %p396_p0 = scmp.ge.s32.totalorder %s458_s14, 1  ;;  %s458_s14 = sphi %s486_s14, %s13_s14   ;;  %s454_s13 = sphi %s484_s13, %s526_s13   ;;  %s450_s12 = sphi %s482_s12, %s525_s12  }
   0x3   : > { %p27_p1 = scmp.ge.s32.totalorder %s25_s15, 2  ;;  %p158_p2 = scmp.lt.s32.totalorder %s458_s14, 3 }
   0x5   : > { %s528_s15 = smov (%p27_p1, %s25_s15), 0  ;;  %p159_p3 = pnand %p396_p0, %p158_p2 }
   0x6   : > { %p191_p4 = scmp.lt.s32.totalorder (!%p159_p3), %s450_s12, 1  ;;  %v460_v0 = vmov (!%p159_p3), 0.0   ;;  %v212_v1 = vld [vmem:[%s523_s2] sm:$0xf] (!%p159_p3)  ;;  %v461_v2 = vmov (!%p159_p3), 0   ;;  %vm224_vm0 = vcmask (!%p159_p3), 1043456  }
   0x7   : > { %162 = sbr.rel (%p159_p3) target bundleno = 240 (0xf0), region = 32  ;;  %293 = vmatprep.mubr.f32.mxu0 (!%p159_p3), %v460_v0  ;;  %434 = vset.pattern.permute.xlu0 (!%p159_p3), %v461_v2  ;;  %v211_v5 = vld [vmem:[%s522_s1] sm:$0xf] (!%p159_p3)  ;;  %vm220_vm1 = vcmask (!%p159_p3), 31744  }
   0x8   : > { %215 = vperm.xlu0 (!%p159_p3), %434, %v212_v1  }
   0xe   : > { %s530_s12 = smov (!%p191_p4, %s450_s12), 1 }
   0xf   : > { %s406_s18 = sshll.u32 %s530_s12, 3 }
  0x10   : > { %s198_s21 = scalar_lea.vmem %s521_s0, %s406_s18  ;;  %s208_s26 = scalar_lea.vmem %s524_s3, %s406_s18 }
  0x11   : > { %v210_v3 = vld [vmem:[%s198_s21] sm:$0xff] }
  0x12   : > { %v219_v4 = vcombine.high %v210_v3, %v210_v3 }
  0x14   : > { %401 = vmatprep.subr.msk.mxu0 %vm224_vm0, %v219_v4 }
  0x15   : > { %402 = vmatpush1.msk.msra.mxu0 %vm224_vm0, %v210_v3 }
  0x16   : > { %403 = vmatmul.mubr.msk.f32.vlgmr.msra.gmra.mrb[0].mxu0 %vm220_vm1, %v211_v5 }
  0x87   : > { %v216_v6 = vpop.permute.xlu0 %215 }
  0xe9   : > { %v295_v7 = vpop.f32.mrb[0].mxu0 }
  0xea   : > { %v296_v8 = vadd.f32 %v295_v7, %v216_v6  ;;  %v297_v9 = vpop.f32.mrb[1].mxu0 }
  0xeb   : > { %v298_v10 = vadd.f32 %v297_v9, %v216_v6 }
  0xed   : > { %v302_v11 = vcombine.low %v296_v8, %v298_v10 }
  0xef   : > { %304 = vst [vmem:[%s208_s26] sm:$0xff] %v302_v11 }
  0xf0 PF: > { %s13_s14 = sadd.s32 1, %s458_s14   ;;  %s525_s12 = smov %s454_s13 }
  0xf1   : > { %p10_p5 = scmp.ge.s32.totalorder %s13_s14, 4   ;;  %s526_s13 = smov %s528_s15 }
  0xf3   :  { %12 = sbr.rel (!%p10_p5) target bundleno = 2 (0x2), region = 62 }

</bundles_post_ra>
